<compile_context>
chip_gen: v7x
topology: tpu7x:2x2x1
jax: 0.10.0
libtpu: 0.0.40
codegen_flags: <defaults>
</compile_context>

<pallas_src>
import functools

import jax
import jax.numpy as jnp
from jax.experimental import pallas as pl
from jax.experimental.pallas import tpu as pltpu


def _round_up(x, m):
    return (x + m - 1) // m * m


def _fused_textcnn_kernel(seq_len, p_pad, l_pad, hidden, n_filters, max_fs,
                          filter_sizes,
                          ids_ref, emb_hbm, w_ref, b_ref, o_ref,
                          emb_vmem, copy_sems):
    """Single grid step: gather embeddings, conv (one matmul), ReLU, max-pool."""
    # ---- Fused embedding gather: one row DMA per token, HBM -> VMEM. -------
    # Zero the padding rows first (disjoint from the DMA target rows) so that
    # padded taps / positions contribute exact zeros to the matmul.
    if l_pad > seq_len:
        emb_vmem[pl.ds(seq_len, l_pad - seq_len), :] = jnp.zeros(
            (l_pad - seq_len, hidden), jnp.float32)
    for t in range(seq_len):                       # static unroll; all DMAs in flight
        pltpu.make_async_copy(
            emb_hbm.at[pl.ds(ids_ref[t], 1), :],
            emb_vmem.at[pl.ds(t, 1), :],
            copy_sems.at[t]).start()
    for t in range(seq_len):
        pltpu.make_async_copy(
            emb_hbm.at[pl.ds(0, 1), :],            # only the shape matters for wait
            emb_vmem.at[pl.ds(t, 1), :],
            copy_sems.at[t]).wait()

    # ---- All filter sizes as ONE K = max_fs*H matmul on the MXU. -----------
    # lhs row t = concat(emb[t], ..., emb[t+max_fs-1]) along lanes.
    lhs = jnp.concatenate(
        [emb_vmem[pl.ds(k, p_pad), :] for k in range(max_fs)], axis=1)
    s = jnp.dot(lhs, w_ref[...], preferred_element_type=jnp.float32)
    s = jnp.maximum(s + b_ref[...], 0.0)           # bias + ReLU (f32, VPU)

    # ---- Per-filter-size masked max-pool over valid positions. -------------
    pos = jax.lax.broadcasted_iota(jnp.int32, (p_pad, 1), 0)
    rows = []
    for j, fs in enumerate(filter_sizes):
        blk = s[:, j * n_filters:(j + 1) * n_filters]          # aligned 128-lane slice
        n_valid = seq_len - fs + 1
        if n_valid < p_pad:        # static check; masking to 0 is safe post-ReLU
            blk = jnp.where(pos < n_valid, blk, 0.0)
        rows.append(jnp.max(blk, axis=0, keepdims=True))       # (1, F) sublane reduce
    o_ref[...] = jnp.concatenate(rows, axis=0)                 # (n_fs, F), lane-dense


def prepare_conv_params(conv_weights, conv_biases, filter_sizes):
    """Hoisted once at parameter-load time: build the (max_fs*H, n_fs*F) slab."""
    max_fs = max(filter_sizes)
    n_fs = len(filter_sizes)
    n_filters, _, _, hidden = conv_weights[0].shape
    w_slab = jnp.zeros((max_fs * hidden, n_fs * n_filters), jnp.float32)
    b_slab = jnp.zeros((1, n_fs * n_filters), jnp.float32)
    for j, (fs, w, b) in enumerate(zip(filter_sizes, conv_weights, conv_biases)):
        # Conv2d weight (F, 1, fs, H): tap k multiplies emb[t+k] -> rows k*H..(k+1)*H.
        w_taps = jnp.transpose(w[:, 0, :, :], (1, 2, 0)).astype(jnp.float32)  # (fs,H,F)
        w_slab = w_slab.at[:fs * hidden, j * n_filters:(j + 1) * n_filters].set(
            w_taps.reshape(fs * hidden, n_filters))
        b_slab = b_slab.at[0, j * n_filters:(j + 1) * n_filters].set(
            b.astype(jnp.float32))
    return w_slab, b_slab


def make_statement_forward(embedding_table, conv_weights, conv_biases, filter_sizes):
    """Returns a jitted forward: token_ids (L,) -> (len(filter_sizes), F) float32."""
    hidden = embedding_table.shape[1]
    n_fs = len(filter_sizes)
    max_fs = max(filter_sizes)
    min_fs = min(filter_sizes)
    n_filters = conv_weights[0].shape[0]
    w_slab, b_slab = prepare_conv_params(conv_weights, conv_biases, filter_sizes)
    emb_table = embedding_table.astype(jnp.float32)

    @jax.jit
    def forward(token_ids):
        seq_len = token_ids.shape[0]
        if seq_len < max_fs:
            raise ValueError(
                f"seq_len={seq_len} must be >= max(filter_sizes)={max_fs} "
                "(the PyTorch Conv2d 'valid' window would fail here too).")
        # NOTE: p_pad/l_pad are static per seq_len, so each distinct statement
        # length specializes (recompiles) forward().  TODO(synk): bucket lengths.
        p_pad = _round_up(seq_len - min_fs + 1, 8)   # padded position count
        l_pad = _round_up(p_pad + max_fs - 1, 8)     # rows reachable by tap shifts

        kernel = functools.partial(
            _fused_textcnn_kernel, seq_len, p_pad, l_pad, hidden, n_filters,
            max_fs, tuple(filter_sizes))

        out = pl.pallas_call(
            kernel,
            out_shape=jax.ShapeDtypeStruct((n_fs, n_filters), jnp.float32),
            grid_spec=pltpu.PrefetchScalarGridSpec(
                num_scalar_prefetch=1,                 # token ids -> SMEM
                grid=(1,),                             # single step: no per-step overhead
                in_specs=[
                    pl.BlockSpec(memory_space=pl.ANY),                  # emb table (HBM)
                    pl.BlockSpec((max_fs * hidden, n_fs * n_filters),
                                 lambda i, ids: (0, 0)),                # weight slab
                    pl.BlockSpec((1, n_fs * n_filters),
                                 lambda i, ids: (0, 0)),                # bias slab
                ],
                out_specs=pl.BlockSpec((n_fs, n_filters),
                                       lambda i, ids: (0, 0)),
                scratch_shapes=[
                    pltpu.VMEM((l_pad, hidden), jnp.float32),   # gathered embeddings
                    pltpu.SemaphoreType.DMA((seq_len,)),        # one sem per row DMA
                ],
            ),
            compiler_params=pltpu.CompilerParams(
                dimension_semantics=("arbitrary",)),
        )(token_ids.astype(jnp.int32), emb_table, w_slab, b_slab)
        return out

    return forward


def _reference_forward(token_ids, embedding_table, conv_weights, conv_biases, filter_sizes):
    emb = embedding_table[token_ids].astype(jnp.float32)
    L, H = emb.shape
    outs = []
    for fs, w, b in zip(filter_sizes, conv_weights, conv_biases):
        P = L - fs + 1
        windows = jnp.concatenate([emb[k:k + P, :] for k in range(fs)], axis=1)
        s = windows @ w.reshape(w.shape[0], fs * H).T + b[None, :]
        s = jnp.maximum(s, 0.0)
        outs.append(jnp.max(s, axis=0, keepdims=True))
    return jnp.concatenate(outs, axis=0)


if __name__ == "__main__":
    # Small, forward-consistent shapes.
    vocab_size = 50
    hidden_size = 32       # embedding dim H
    seq_len = 8            # statement length L
    number_filters = 128   # F (lane-dense)
    filter_sizes = [2, 3, 4]

    key = jax.random.PRNGKey(0)
    k_emb, k_ids, *k_conv = jax.random.split(key, 2 + 2 * len(filter_sizes))

    embedding_table = jax.random.normal(k_emb, (vocab_size, hidden_size), jnp.float32) * 0.1
    token_ids = jax.random.randint(k_ids, (seq_len,), 0, vocab_size)

    conv_weights, conv_biases = [], []
    for i, fs in enumerate(filter_sizes):
        kw, kb = k_conv[2 * i], k_conv[2 * i + 1]
        conv_weights.append(
            jax.random.normal(kw, (number_filters, 1, fs, hidden_size), jnp.float32) * 0.05)
        conv_biases.append(
            jax.random.normal(kb, (number_filters,), jnp.float32) * 0.01)

    forward = make_statement_forward(embedding_table, conv_weights, conv_biases, filter_sizes)
    out = forward(token_ids)
    out = jax.block_until_ready(out)
    assert out.shape == (len(filter_sizes), number_filters), out.shape

    ref = _reference_forward(token_ids, embedding_table, conv_weights,
                             conv_biases, filter_sizes)
    assert jnp.allclose(out, ref, atol=1e-5, rtol=1e-5), float(jnp.max(jnp.abs(out - ref)))

    print("KERNEL_OK")
</pallas_src>

<mosaic_0001>
module attributes {stable_mosaic.version = 11 : i64} {
  func.func @_fused_textcnn_kernel(%arg0: i32, %arg1: memref<8xi32, #tpu.memory_space<smem>>, %arg2: memref<50x32xf32, #tpu.memory_space<any>>, %arg3: memref<128x384xf32, #tpu.memory_space<vmem>>, %arg4: memref<1x384xf32, #tpu.memory_space<vmem>>, %arg5: memref<3x128xf32, #tpu.memory_space<vmem>>, %arg6: memref<16x32xf32, #tpu.memory_space<vmem>>, %arg7: memref<8x!tpu.dma_semaphore, #tpu.memory_space<semaphore_mem>>) attributes {dimension_semantics = [#tpu.dimension_semantics<arbitrary>], iteration_bounds = array<i64: 1>, scalar_prefetch = 1 : i64, scratch_operands = 2 : i64, tpu.core_type = #tpu.core_type<tc>, window_params = [{}, {pipeline_mode = #tpu.pipeline_mode<synchronous>, transform_indices = @transform_1, window_bounds = array<i64: 128, 384>}, {pipeline_mode = #tpu.pipeline_mode<synchronous>, transform_indices = @transform_2, window_bounds = array<i64: 1, 384>}, {pipeline_mode = #tpu.pipeline_mode<synchronous>, transform_indices = @transform_3, window_bounds = array<i64: 3, 128>}]} {
    %cst = arith.constant 0.000000e+00 : f32
    %0 = vector.broadcast %cst : f32 to vector<8x32xf32>
    %c8 = arith.constant 8 : index
    %c0 = arith.constant 0 : index
    %1 = vector.load %arg6[%c8, %c0] : memref<16x32xf32, #tpu.memory_space<vmem>>, vector<8x32xf32>
    tpu.vector_store %arg6[%c8, %c0], %0 {strides = array<i32>} : memref<16x32xf32, #tpu.memory_space<vmem>>, vector<8x32xf32>,
    %c0_0 = arith.constant 0 : index
    %2 = memref.load %arg1[%c0_0] : memref<8xi32, #tpu.memory_space<smem>>
    %c0_i32 = arith.constant 0 : i32
    %c0_i32_1 = arith.constant 0 : i32
    %3 = tpu.memref_slice %arg2[%2, %c0_i32_1] : memref<50x32xf32, #tpu.memory_space<any>> -> memref<1x32xf32, #tpu.memory_space<any>>
    %c0_i32_2 = arith.constant 0 : i32
    %c0_i32_3 = arith.constant 0 : i32
    %4 = tpu.memref_slice %arg6[%c0_i32_2, %c0_i32_3] : memref<16x32xf32, #tpu.memory_space<vmem>> -> memref<1x32xf32, #tpu.memory_space<vmem>>
    %5 = tpu.memref_slice %arg7[%c0_i32] : memref<8x!tpu.dma_semaphore, #tpu.memory_space<semaphore_mem>> -> memref<1x!tpu.dma_semaphore, #tpu.memory_space<semaphore_mem>>
    %6 = tpu.memref_squeeze %5 : memref<1x!tpu.dma_semaphore, #tpu.memory_space<semaphore_mem>> -> memref<!tpu.dma_semaphore, #tpu.memory_space<semaphore_mem>>
    tpu.enqueue_dma source(%3 : memref<1x32xf32, #tpu.memory_space<any>>) target(%4 : memref<1x32xf32, #tpu.memory_space<vmem>>) target_semaphore(%6 : memref<!tpu.dma_semaphore, #tpu.memory_space<semaphore_mem>>)
    %c1 = arith.constant 1 : index
    %7 = memref.load %arg1[%c1] : memref<8xi32, #tpu.memory_space<smem>>
    %c1_i32 = arith.constant 1 : i32
    %c0_i32_4 = arith.constant 0 : i32
    %8 = tpu.memref_slice %arg2[%7, %c0_i32_4] : memref<50x32xf32, #tpu.memory_space<any>> -> memref<1x32xf32, #tpu.memory_space<any>>
    %c1_i32_5 = arith.constant 1 : i32
    %c0_i32_6 = arith.constant 0 : i32
    %9 = tpu.memref_slice %arg6[%c1_i32_5, %c0_i32_6] : memref<16x32xf32, #tpu.memory_space<vmem>> -> memref<1x32xf32, #tpu.memory_space<vmem>>
    %10 = tpu.memref_slice %arg7[%c1_i32] : memref<8x!tpu.dma_semaphore, #tpu.memory_space<semaphore_mem>> -> memref<1x!tpu.dma_semaphore, #tpu.memory_space<semaphore_mem>>
    %11 = tpu.memref_squeeze %10 : memref<1x!tpu.dma_semaphore, #tpu.memory_space<semaphore_mem>> -> memref<!tpu.dma_semaphore, #tpu.memory_space<semaphore_mem>>
    tpu.enqueue_dma source(%8 : memref<1x32xf32, #tpu.memory_space<any>>) target(%9 : memref<1x32xf32, #tpu.memory_space<vmem>>) target_semaphore(%11 : memref<!tpu.dma_semaphore, #tpu.memory_space<semaphore_mem>>)
    %c2 = arith.constant 2 : index
    %12 = memref.load %arg1[%c2] : memref<8xi32, #tpu.memory_space<smem>>
    %c2_i32 = arith.constant 2 : i32
    %c0_i32_7 = arith.constant 0 : i32
    %13 = tpu.memref_slice %arg2[%12, %c0_i32_7] : memref<50x32xf32, #tpu.memory_space<any>> -> memref<1x32xf32, #tpu.memory_space<any>>
    %c2_i32_8 = arith.constant 2 : i32
    %c0_i32_9 = arith.constant 0 : i32
    %14 = tpu.memref_slice %arg6[%c2_i32_8, %c0_i32_9] : memref<16x32xf32, #tpu.memory_space<vmem>> -> memref<1x32xf32, #tpu.memory_space<vmem>>
    %15 = tpu.memref_slice %arg7[%c2_i32] : memref<8x!tpu.dma_semaphore, #tpu.memory_space<semaphore_mem>> -> memref<1x!tpu.dma_semaphore, #tpu.memory_space<semaphore_mem>>
    %16 = tpu.memref_squeeze %15 : memref<1x!tpu.dma_semaphore, #tpu.memory_space<semaphore_mem>> -> memref<!tpu.dma_semaphore, #tpu.memory_space<semaphore_mem>>
    tpu.enqueue_dma source(%13 : memref<1x32xf32, #tpu.memory_space<any>>) target(%14 : memref<1x32xf32, #tpu.memory_space<vmem>>) target_semaphore(%16 : memref<!tpu.dma_semaphore, #tpu.memory_space<semaphore_mem>>)
    %c3 = arith.constant 3 : index
    %17 = memref.load %arg1[%c3] : memref<8xi32, #tpu.memory_space<smem>>
    %c3_i32 = arith.constant 3 : i32
    %c0_i32_10 = arith.constant 0 : i32
    %18 = tpu.memref_slice %arg2[%17, %c0_i32_10] : memref<50x32xf32, #tpu.memory_space<any>> -> memref<1x32xf32, #tpu.memory_space<any>>
    %c3_i32_11 = arith.constant 3 : i32
    %c0_i32_12 = arith.constant 0 : i32
    %19 = tpu.memref_slice %arg6[%c3_i32_11, %c0_i32_12] : memref<16x32xf32, #tpu.memory_space<vmem>> -> memref<1x32xf32, #tpu.memory_space<vmem>>
    %20 = tpu.memref_slice %arg7[%c3_i32] : memref<8x!tpu.dma_semaphore, #tpu.memory_space<semaphore_mem>> -> memref<1x!tpu.dma_semaphore, #tpu.memory_space<semaphore_mem>>
    %21 = tpu.memref_squeeze %20 : memref<1x!tpu.dma_semaphore, #tpu.memory_space<semaphore_mem>> -> memref<!tpu.dma_semaphore, #tpu.memory_space<semaphore_mem>>
    tpu.enqueue_dma source(%18 : memref<1x32xf32, #tpu.memory_space<any>>) target(%19 : memref<1x32xf32, #tpu.memory_space<vmem>>) target_semaphore(%21 : memref<!tpu.dma_semaphore, #tpu.memory_space<semaphore_mem>>)
    %c4 = arith.constant 4 : index
    %22 = memref.load %arg1[%c4] : memref<8xi32, #tpu.memory_space<smem>>
    %c4_i32 = arith.constant 4 : i32
    %c0_i32_13 = arith.constant 0 : i32
    %23 = tpu.memref_slice %arg2[%22, %c0_i32_13] : memref<50x32xf32, #tpu.memory_space<any>> -> memref<1x32xf32, #tpu.memory_space<any>>
    %c4_i32_14 = arith.constant 4 : i32
    %c0_i32_15 = arith.constant 0 : i32
    %24 = tpu.memref_slice %arg6[%c4_i32_14, %c0_i32_15] : memref<16x32xf32, #tpu.memory_space<vmem>> -> memref<1x32xf32, #tpu.memory_space<vmem>>
    %25 = tpu.memref_slice %arg7[%c4_i32] : memref<8x!tpu.dma_semaphore, #tpu.memory_space<semaphore_mem>> -> memref<1x!tpu.dma_semaphore, #tpu.memory_space<semaphore_mem>>
    %26 = tpu.memref_squeeze %25 : memref<1x!tpu.dma_semaphore, #tpu.memory_space<semaphore_mem>> -> memref<!tpu.dma_semaphore, #tpu.memory_space<semaphore_mem>>
    tpu.enqueue_dma source(%23 : memref<1x32xf32, #tpu.memory_space<any>>) target(%24 : memref<1x32xf32, #tpu.memory_space<vmem>>) target_semaphore(%26 : memref<!tpu.dma_semaphore, #tpu.memory_space<semaphore_mem>>)
    %c5 = arith.constant 5 : index
    %27 = memref.load %arg1[%c5] : memref<8xi32, #tpu.memory_space<smem>>
    %c5_i32 = arith.constant 5 : i32
    %c0_i32_16 = arith.constant 0 : i32
    %28 = tpu.memref_slice %arg2[%27, %c0_i32_16] : memref<50x32xf32, #tpu.memory_space<any>> -> memref<1x32xf32, #tpu.memory_space<any>>
    %c5_i32_17 = arith.constant 5 : i32
    %c0_i32_18 = arith.constant 0 : i32
    %29 = tpu.memref_slice %arg6[%c5_i32_17, %c0_i32_18] : memref<16x32xf32, #tpu.memory_space<vmem>> -> memref<1x32xf32, #tpu.memory_space<vmem>>
    %30 = tpu.memref_slice %arg7[%c5_i32] : memref<8x!tpu.dma_semaphore, #tpu.memory_space<semaphore_mem>> -> memref<1x!tpu.dma_semaphore, #tpu.memory_space<semaphore_mem>>
    %31 = tpu.memref_squeeze %30 : memref<1x!tpu.dma_semaphore, #tpu.memory_space<semaphore_mem>> -> memref<!tpu.dma_semaphore, #tpu.memory_space<semaphore_mem>>
    tpu.enqueue_dma source(%28 : memref<1x32xf32, #tpu.memory_space<any>>) target(%29 : memref<1x32xf32, #tpu.memory_space<vmem>>) target_semaphore(%31 : memref<!tpu.dma_semaphore, #tpu.memory_space<semaphore_mem>>)
    %c6 = arith.constant 6 : index
    %32 = memref.load %arg1[%c6] : memref<8xi32, #tpu.memory_space<smem>>
    %c6_i32 = arith.constant 6 : i32
    %c0_i32_19 = arith.constant 0 : i32
    %33 = tpu.memref_slice %arg2[%32, %c0_i32_19] : memref<50x32xf32, #tpu.memory_space<any>> -> memref<1x32xf32, #tpu.memory_space<any>>
    %c6_i32_20 = arith.constant 6 : i32
    %c0_i32_21 = arith.constant 0 : i32
    %34 = tpu.memref_slice %arg6[%c6_i32_20, %c0_i32_21] : memref<16x32xf32, #tpu.memory_space<vmem>> -> memref<1x32xf32, #tpu.memory_space<vmem>>
    %35 = tpu.memref_slice %arg7[%c6_i32] : memref<8x!tpu.dma_semaphore, #tpu.memory_space<semaphore_mem>> -> memref<1x!tpu.dma_semaphore, #tpu.memory_space<semaphore_mem>>
    %36 = tpu.memref_squeeze %35 : memref<1x!tpu.dma_semaphore, #tpu.memory_space<semaphore_mem>> -> memref<!tpu.dma_semaphore, #tpu.memory_space<semaphore_mem>>
    tpu.enqueue_dma source(%33 : memref<1x32xf32, #tpu.memory_space<any>>) target(%34 : memref<1x32xf32, #tpu.memory_space<vmem>>) target_semaphore(%36 : memref<!tpu.dma_semaphore, #tpu.memory_space<semaphore_mem>>)
    %c7 = arith.constant 7 : index
    %37 = memref.load %arg1[%c7] : memref<8xi32, #tpu.memory_space<smem>>
    %c7_i32 = arith.constant 7 : i32
    %c0_i32_22 = arith.constant 0 : i32
    %38 = tpu.memref_slice %arg2[%37, %c0_i32_22] : memref<50x32xf32, #tpu.memory_space<any>> -> memref<1x32xf32, #tpu.memory_space<any>>
    %c7_i32_23 = arith.constant 7 : i32
    %c0_i32_24 = arith.constant 0 : i32
    %39 = tpu.memref_slice %arg6[%c7_i32_23, %c0_i32_24] : memref<16x32xf32, #tpu.memory_space<vmem>> -> memref<1x32xf32, #tpu.memory_space<vmem>>
    %40 = tpu.memref_slice %arg7[%c7_i32] : memref<8x!tpu.dma_semaphore, #tpu.memory_space<semaphore_mem>> -> memref<1x!tpu.dma_semaphore, #tpu.memory_space<semaphore_mem>>
    %41 = tpu.memref_squeeze %40 : memref<1x!tpu.dma_semaphore, #tpu.memory_space<semaphore_mem>> -> memref<!tpu.dma_semaphore, #tpu.memory_space<semaphore_mem>>
    tpu.enqueue_dma source(%38 : memref<1x32xf32, #tpu.memory_space<any>>) target(%39 : memref<1x32xf32, #tpu.memory_space<vmem>>) target_semaphore(%41 : memref<!tpu.dma_semaphore, #tpu.memory_space<semaphore_mem>>)
    %c0_i32_25 = arith.constant 0 : i32
    %c0_i32_26 = arith.constant 0 : i32
    %c0_i32_27 = arith.constant 0 : i32
    %42 = tpu.memref_slice %arg2[%c0_i32_26, %c0_i32_27] : memref<50x32xf32, #tpu.memory_space<any>> -> memref<1x32xf32, #tpu.memory_space<any>>
    %c0_i32_28 = arith.constant 0 : i32
    %c0_i32_29 = arith.constant 0 : i32
    %43 = tpu.memref_slice %arg6[%c0_i32_28, %c0_i32_29] : memref<16x32xf32, #tpu.memory_space<vmem>> -> memref<1x32xf32, #tpu.memory_space<vmem>>
    %44 = tpu.memref_slice %arg7[%c0_i32_25] : memref<8x!tpu.dma_semaphore, #tpu.memory_space<semaphore_mem>> -> memref<1x!tpu.dma_semaphore, #tpu.memory_space<semaphore_mem>>
    %45 = tpu.memref_squeeze %44 : memref<1x!tpu.dma_semaphore, #tpu.memory_space<semaphore_mem>> -> memref<!tpu.dma_semaphore, #tpu.memory_space<semaphore_mem>>
    tpu.wait_dma2 semaphore(%45 : memref<!tpu.dma_semaphore, #tpu.memory_space<semaphore_mem>>) src(%42 : memref<1x32xf32, #tpu.memory_space<any>>) dst(%43 : memref<1x32xf32, #tpu.memory_space<vmem>>)
    %c1_i32_30 = arith.constant 1 : i32
    %c0_i32_31 = arith.constant 0 : i32
    %c0_i32_32 = arith.constant 0 : i32
    %46 = tpu.memref_slice %arg2[%c0_i32_31, %c0_i32_32] : memref<50x32xf32, #tpu.memory_space<any>> -> memref<1x32xf32, #tpu.memory_space<any>>
    %c1_i32_33 = arith.constant 1 : i32
    %c0_i32_34 = arith.constant 0 : i32
    %47 = tpu.memref_slice %arg6[%c1_i32_33, %c0_i32_34] : memref<16x32xf32, #tpu.memory_space<vmem>> -> memref<1x32xf32, #tpu.memory_space<vmem>>
    %48 = tpu.memref_slice %arg7[%c1_i32_30] : memref<8x!tpu.dma_semaphore, #tpu.memory_space<semaphore_mem>> -> memref<1x!tpu.dma_semaphore, #tpu.memory_space<semaphore_mem>>
    %49 = tpu.memref_squeeze %48 : memref<1x!tpu.dma_semaphore, #tpu.memory_space<semaphore_mem>> -> memref<!tpu.dma_semaphore, #tpu.memory_space<semaphore_mem>>
    tpu.wait_dma2 semaphore(%49 : memref<!tpu.dma_semaphore, #tpu.memory_space<semaphore_mem>>) src(%46 : memref<1x32xf32, #tpu.memory_space<any>>) dst(%47 : memref<1x32xf32, #tpu.memory_space<vmem>>)
    %c2_i32_35 = arith.constant 2 : i32
    %c0_i32_36 = arith.constant 0 : i32
    %c0_i32_37 = arith.constant 0 : i32
    %50 = tpu.memref_slice %arg2[%c0_i32_36, %c0_i32_37] : memref<50x32xf32, #tpu.memory_space<any>> -> memref<1x32xf32, #tpu.memory_space<any>>
    %c2_i32_38 = arith.constant 2 : i32
    %c0_i32_39 = arith.constant 0 : i32
    %51 = tpu.memref_slice %arg6[%c2_i32_38, %c0_i32_39] : memref<16x32xf32, #tpu.memory_space<vmem>> -> memref<1x32xf32, #tpu.memory_space<vmem>>
    %52 = tpu.memref_slice %arg7[%c2_i32_35] : memref<8x!tpu.dma_semaphore, #tpu.memory_space<semaphore_mem>> -> memref<1x!tpu.dma_semaphore, #tpu.memory_space<semaphore_mem>>
    %53 = tpu.memref_squeeze %52 : memref<1x!tpu.dma_semaphore, #tpu.memory_space<semaphore_mem>> -> memref<!tpu.dma_semaphore, #tpu.memory_space<semaphore_mem>>
    tpu.wait_dma2 semaphore(%53 : memref<!tpu.dma_semaphore, #tpu.memory_space<semaphore_mem>>) src(%50 : memref<1x32xf32, #tpu.memory_space<any>>) dst(%51 : memref<1x32xf32, #tpu.memory_space<vmem>>)
    %c3_i32_40 = arith.constant 3 : i32
    %c0_i32_41 = arith.constant 0 : i32
    %c0_i32_42 = arith.constant 0 : i32
    %54 = tpu.memref_slice %arg2[%c0_i32_41, %c0_i32_42] : memref<50x32xf32, #tpu.memory_space<any>> -> memref<1x32xf32, #tpu.memory_space<any>>
    %c3_i32_43 = arith.constant 3 : i32
    %c0_i32_44 = arith.constant 0 : i32
    %55 = tpu.memref_slice %arg6[%c3_i32_43, %c0_i32_44] : memref<16x32xf32, #tpu.memory_space<vmem>> -> memref<1x32xf32, #tpu.memory_space<vmem>>
    %56 = tpu.memref_slice %arg7[%c3_i32_40] : memref<8x!tpu.dma_semaphore, #tpu.memory_space<semaphore_mem>> -> memref<1x!tpu.dma_semaphore, #tpu.memory_space<semaphore_mem>>
    %57 = tpu.memref_squeeze %56 : memref<1x!tpu.dma_semaphore, #tpu.memory_space<semaphore_mem>> -> memref<!tpu.dma_semaphore, #tpu.memory_space<semaphore_mem>>
    tpu.wait_dma2 semaphore(%57 : memref<!tpu.dma_semaphore, #tpu.memory_space<semaphore_mem>>) src(%54 : memref<1x32xf32, #tpu.memory_space<any>>) dst(%55 : memref<1x32xf32, #tpu.memory_space<vmem>>)
    %c4_i32_45 = arith.constant 4 : i32
    %c0_i32_46 = arith.constant 0 : i32
    %c0_i32_47 = arith.constant 0 : i32
    %58 = tpu.memref_slice %arg2[%c0_i32_46, %c0_i32_47] : memref<50x32xf32, #tpu.memory_space<any>> -> memref<1x32xf32, #tpu.memory_space<any>>
    %c4_i32_48 = arith.constant 4 : i32
    %c0_i32_49 = arith.constant 0 : i32
    %59 = tpu.memref_slice %arg6[%c4_i32_48, %c0_i32_49] : memref<16x32xf32, #tpu.memory_space<vmem>> -> memref<1x32xf32, #tpu.memory_space<vmem>>
    %60 = tpu.memref_slice %arg7[%c4_i32_45] : memref<8x!tpu.dma_semaphore, #tpu.memory_space<semaphore_mem>> -> memref<1x!tpu.dma_semaphore, #tpu.memory_space<semaphore_mem>>
    %61 = tpu.memref_squeeze %60 : memref<1x!tpu.dma_semaphore, #tpu.memory_space<semaphore_mem>> -> memref<!tpu.dma_semaphore, #tpu.memory_space<semaphore_mem>>
    tpu.wait_dma2 semaphore(%61 : memref<!tpu.dma_semaphore, #tpu.memory_space<semaphore_mem>>) src(%58 : memref<1x32xf32, #tpu.memory_space<any>>) dst(%59 : memref<1x32xf32, #tpu.memory_space<vmem>>)
    %c5_i32_50 = arith.constant 5 : i32
    %c0_i32_51 = arith.constant 0 : i32
    %c0_i32_52 = arith.constant 0 : i32
    %62 = tpu.memref_slice %arg2[%c0_i32_51, %c0_i32_52] : memref<50x32xf32, #tpu.memory_space<any>> -> memref<1x32xf32, #tpu.memory_space<any>>
    %c5_i32_53 = arith.constant 5 : i32
    %c0_i32_54 = arith.constant 0 : i32
    %63 = tpu.memref_slice %arg6[%c5_i32_53, %c0_i32_54] : memref<16x32xf32, #tpu.memory_space<vmem>> -> memref<1x32xf32, #tpu.memory_space<vmem>>
    %64 = tpu.memref_slice %arg7[%c5_i32_50] : memref<8x!tpu.dma_semaphore, #tpu.memory_space<semaphore_mem>> -> memref<1x!tpu.dma_semaphore, #tpu.memory_space<semaphore_mem>>
    %65 = tpu.memref_squeeze %64 : memref<1x!tpu.dma_semaphore, #tpu.memory_space<semaphore_mem>> -> memref<!tpu.dma_semaphore, #tpu.memory_space<semaphore_mem>>
    tpu.wait_dma2 semaphore(%65 : memref<!tpu.dma_semaphore, #tpu.memory_space<semaphore_mem>>) src(%62 : memref<1x32xf32, #tpu.memory_space<any>>) dst(%63 : memref<1x32xf32, #tpu.memory_space<vmem>>)
    %c6_i32_55 = arith.constant 6 : i32
    %c0_i32_56 = arith.constant 0 : i32
    %c0_i32_57 = arith.constant 0 : i32
    %66 = tpu.memref_slice %arg2[%c0_i32_56, %c0_i32_57] : memref<50x32xf32, #tpu.memory_space<any>> -> memref<1x32xf32, #tpu.memory_space<any>>
    %c6_i32_58 = arith.constant 6 : i32
    %c0_i32_59 = arith.constant 0 : i32
    %67 = tpu.memref_slice %arg6[%c6_i32_58, %c0_i32_59] : memref<16x32xf32, #tpu.memory_space<vmem>> -> memref<1x32xf32, #tpu.memory_space<vmem>>
    %68 = tpu.memref_slice %arg7[%c6_i32_55] : memref<8x!tpu.dma_semaphore, #tpu.memory_space<semaphore_mem>> -> memref<1x!tpu.dma_semaphore, #tpu.memory_space<semaphore_mem>>
    %69 = tpu.memref_squeeze %68 : memref<1x!tpu.dma_semaphore, #tpu.memory_space<semaphore_mem>> -> memref<!tpu.dma_semaphore, #tpu.memory_space<semaphore_mem>>
    tpu.wait_dma2 semaphore(%69 : memref<!tpu.dma_semaphore, #tpu.memory_space<semaphore_mem>>) src(%66 : memref<1x32xf32, #tpu.memory_space<any>>) dst(%67 : memref<1x32xf32, #tpu.memory_space<vmem>>)
    %c7_i32_60 = arith.constant 7 : i32
    %c0_i32_61 = arith.constant 0 : i32
    %c0_i32_62 = arith.constant 0 : i32
    %70 = tpu.memref_slice %arg2[%c0_i32_61, %c0_i32_62] : memref<50x32xf32, #tpu.memory_space<any>> -> memref<1x32xf32, #tpu.memory_space<any>>
    %c7_i32_63 = arith.constant 7 : i32
    %c0_i32_64 = arith.constant 0 : i32
    %71 = tpu.memref_slice %arg6[%c7_i32_63, %c0_i32_64] : memref<16x32xf32, #tpu.memory_space<vmem>> -> memref<1x32xf32, #tpu.memory_space<vmem>>
    %72 = tpu.memref_slice %arg7[%c7_i32_60] : memref<8x!tpu.dma_semaphore, #tpu.memory_space<semaphore_mem>> -> memref<1x!tpu.dma_semaphore, #tpu.memory_space<semaphore_mem>>
    %73 = tpu.memref_squeeze %72 : memref<1x!tpu.dma_semaphore, #tpu.memory_space<semaphore_mem>> -> memref<!tpu.dma_semaphore, #tpu.memory_space<semaphore_mem>>
    tpu.wait_dma2 semaphore(%73 : memref<!tpu.dma_semaphore, #tpu.memory_space<semaphore_mem>>) src(%70 : memref<1x32xf32, #tpu.memory_space<any>>) dst(%71 : memref<1x32xf32, #tpu.memory_space<vmem>>)
    %c0_65 = arith.constant 0 : index
    %c0_66 = arith.constant 0 : index
    %74 = vector.load %arg6[%c0_65, %c0_66] : memref<16x32xf32, #tpu.memory_space<vmem>>, vector<8x32xf32>
    %c1_67 = arith.constant 1 : index
    %c0_68 = arith.constant 0 : index
    %75 = vector.load %arg6[%c1_67, %c0_68] : memref<16x32xf32, #tpu.memory_space<vmem>>, vector<8x32xf32>
    %c2_69 = arith.constant 2 : index
    %c0_70 = arith.constant 0 : index
    %76 = vector.load %arg6[%c2_69, %c0_70] : memref<16x32xf32, #tpu.memory_space<vmem>>, vector<8x32xf32>
    %c3_71 = arith.constant 3 : index
    %c0_72 = arith.constant 0 : index
    %77 = vector.load %arg6[%c3_71, %c0_72] : memref<16x32xf32, #tpu.memory_space<vmem>>, vector<8x32xf32>
    %78 = tpu.concatenate %74, %75, %76, %77 in 1 : vector<8x32xf32>, vector<8x32xf32>, vector<8x32xf32>, vector<8x32xf32> -> vector<8x128xf32>
    %c0_73 = arith.constant 0 : index
    %c0_74 = arith.constant 0 : index
    %79 = vector.load %arg3[%c0_73, %c0_74] : memref<128x384xf32, #tpu.memory_space<vmem>>, vector<128x384xf32>
    %cst_75 = arith.constant dense<0.000000e+00> : vector<8x384xf32>
    %80 = tpu.matmul %78, %79, %cst_75 {dimension_numbers = #tpu.dot_dimension_numbers<[1], [0], [0], [1], [0, 0, 1, 1], [], []>} : vector<8x128xf32>, vector<128x384xf32>, vector<8x384xf32> -> vector<8x384xf32>
    %c0_76 = arith.constant 0 : index
    %c0_77 = arith.constant 0 : index
    %81 = vector.load %arg4[%c0_76, %c0_77] : memref<1x384xf32, #tpu.memory_space<vmem>>, vector<1x384xf32>
    %82 = vector.broadcast %81 : vector<1x384xf32> to vector<8x384xf32>
    %83 = arith.addf %80, %82 : vector<8x384xf32>
    %cst_78 = arith.constant 0.000000e+00 : f32
    %84 = vector.broadcast %cst_78 : f32 to vector<8x384xf32>
    %85 = arith.maximumf %83, %84 : vector<8x384xf32>
    %86 = tpu.iota {dimensions = array<i32: 0>} : vector<8x1xi32>
    %87 = vector.extract_strided_slice %85 {offsets = [0, 0], sizes = [8, 128], strides = [1, 1]} : vector<8x384xf32> to vector<8x128xf32>
    %c7_i32_79 = arith.constant 7 : i32
    %88 = vector.broadcast %c7_i32_79 : i32 to vector<8x1xi32>
    %89 = arith.cmpi slt, %86, %88 : vector<8x1xi32>
    %cst_80 = arith.constant 0.000000e+00 : f32
    %90 = vector.shape_cast %89 : vector<8x1xi1> to vector<8x1xi1>
    %91 = vector.broadcast %90 : vector<8x1xi1> to vector<8x128xi1>
    %92 = vector.broadcast %cst_80 : f32 to vector<8x128xf32>
    %93 = arith.select %91, %87, %92 : vector<8x128xi1>, vector<8x128xf32>
    %cst_81 = arith.constant dense<0xFF800000> : vector<128xf32>
    %94 = vector.multi_reduction <maximumf>, %93, %cst_81 [0] : vector<8x128xf32> to vector<128xf32>
    %95 = vector.shape_cast %94 : vector<128xf32> to vector<1x128xf32>
    %96 = vector.extract_strided_slice %85 {offsets = [0, 128], sizes = [8, 128], strides = [1, 1]} : vector<8x384xf32> to vector<8x128xf32>
    %c6_i32_82 = arith.constant 6 : i32
    %97 = vector.broadcast %c6_i32_82 : i32 to vector<8x1xi32>
    %98 = arith.cmpi slt, %86, %97 : vector<8x1xi32>
    %cst_83 = arith.constant 0.000000e+00 : f32
    %99 = vector.shape_cast %98 : vector<8x1xi1> to vector<8x1xi1>
    %100 = vector.broadcast %99 : vector<8x1xi1> to vector<8x128xi1>
    %101 = vector.broadcast %cst_83 : f32 to vector<8x128xf32>
    %102 = arith.select %100, %96, %101 : vector<8x128xi1>, vector<8x128xf32>
    %cst_84 = arith.constant dense<0xFF800000> : vector<128xf32>
    %103 = vector.multi_reduction <maximumf>, %102, %cst_84 [0] : vector<8x128xf32> to vector<128xf32>
    %104 = vector.shape_cast %103 : vector<128xf32> to vector<1x128xf32>
    %105 = vector.extract_strided_slice %85 {offsets = [0, 256], sizes = [8, 128], strides = [1, 1]} : vector<8x384xf32> to vector<8x128xf32>
    %c5_i32_85 = arith.constant 5 : i32
    %106 = vector.broadcast %c5_i32_85 : i32 to vector<8x1xi32>
    %107 = arith.cmpi slt, %86, %106 : vector<8x1xi32>
    %cst_86 = arith.constant 0.000000e+00 : f32
    %108 = vector.shape_cast %107 : vector<8x1xi1> to vector<8x1xi1>
    %109 = vector.broadcast %108 : vector<8x1xi1> to vector<8x128xi1>
    %110 = vector.broadcast %cst_86 : f32 to vector<8x128xf32>
    %111 = arith.select %109, %105, %110 : vector<8x128xi1>, vector<8x128xf32>
    %cst_87 = arith.constant dense<0xFF800000> : vector<128xf32>
    %112 = vector.multi_reduction <maximumf>, %111, %cst_87 [0] : vector<8x128xf32> to vector<128xf32>
    %113 = vector.shape_cast %112 : vector<128xf32> to vector<1x128xf32>
    %114 = tpu.concatenate %95, %104, %113 in 0 : vector<1x128xf32>, vector<1x128xf32>, vector<1x128xf32> -> vector<3x128xf32>
    %c0_88 = arith.constant 0 : index
    %c0_89 = arith.constant 0 : index
    %115 = vector.load %arg5[%c0_88, %c0_89] : memref<3x128xf32, #tpu.memory_space<vmem>>, vector<3x128xf32>
    tpu.vector_store %arg5[%c0_88, %c0_89], %114 {strides = array<i32>} : memref<3x128xf32, #tpu.memory_space<vmem>>, vector<3x128xf32>,
    return
  }
  func.func @transform_1(%arg0: i32, %arg1: memref<8xi32, #tpu.memory_space<smem>>) -> (i32, i32) {
    %c0_i32 = arith.constant 0 : i32
    %c0_i32_0 = arith.constant 0 : i32
    %c0_i32_1 = arith.constant 0 : i32
    return %c0_i32, %c0_i32_0 : i32, i32
  }
  func.func @transform_2(%arg0: i32, %arg1: memref<8xi32, #tpu.memory_space<smem>>) -> (i32, i32) {
    %c0_i32 = arith.constant 0 : i32
    %c0_i32_0 = arith.constant 0 : i32
    %c0_i32_1 = arith.constant 0 : i32
    return %c0_i32, %c0_i32_0 : i32, i32
  }
  func.func @transform_3(%arg0: i32, %arg1: memref<8xi32, #tpu.memory_space<smem>>) -> (i32, i32) {
    %c0_i32 = arith.constant 0 : i32
    %c0_i32_0 = arith.constant 0 : i32
    %c0_i32_1 = arith.constant 0 : i32
    return %c0_i32, %c0_i32_0 : i32, i32
  }
}

</mosaic_0001>

<bundles_post_ra>
// kernel: forward.1
= control target key start
LH: loop header
LB: loop body
LE: loop exit
PB: predicated region body
PF: predicated region fallthrough
CT: control target
= control target key end

     0   :  { %s1175_s0 = inlined_call_operand.hbm [shape: s32[8], index: 0, kind: input, shape index: {}]   ;;  %s1176_s1 = inlined_call_operand.hbm [shape: f32[50,32], index: 1, kind: input, shape index: {}]   ;;  %s1177_s2 = inlined_call_operand.hbm [shape: f32[128,384], index: 2, kind: input, shape index: {}]   ;;  %s1178_s3 = inlined_call_operand.vmem [shape: f32[1,384], index: 3, kind: input, shape index: {}]   ;;  %s1179_s4 = inlined_call_operand.hbm [shape: f32[3,128], index: 4, kind: output, shape index: {}]  }
   0x1   :  { %s680_s17 = scalar_lea.hbm %s1175_s0, 16 }
   0x2   :  { %p681_p0 = scmp.ne.s32.totalorder %s1175_s0, %s680_s17  ;;  %p684_p1 = scmp.lt.u32.totalorder %s680_s17, %s1175_s0 }
   0x4   :  { %p686_p2 = pnand %p684_p1, %p681_p0 }
   0x6   :  { %689 = shalt.err (!%p686_p2)  }
   0x7   :  { %s948_s22 = smov [#allocation5]  }
   0x8   :  { %10 = dma.hbm_to_smem %s1175_s0, 16, %s948_s22, [#allocation4] }
   0x9   :  { %926 = dma.done.wait [#allocation4], 16 }
   0xa   :  { %927 = vsyncadd [#allocation4], 4294967280 }
   0xb   :  { %12 = sfence }
   0xc   :  { %13 = vsyncpa [#allocation7], 0 }
   0xd   :  { %14 = vsyncpa [#allocation8], 0  ;;  %s949_s25 = smov [#allocation6]   ;;  %s690_s29 = scalar_lea.hbm %s1177_s2, 6144 }
   0xe   :  { %s20_s26 = sshll.u32 %s949_s25, 4  ;;  %p691_p3 = scmp.ne.s32.totalorder %s1177_s2, %s690_s29  ;;  %s21_s26 = int_to_ptr.vmem [resolvable:$true] %s20_s26 }
   0xf   :  { %p694_p4 = scmp.lt.u32.totalorder %s690_s29, %s1177_s2 }
  0x11   :  { %p696_p5 = pnand %p694_p4, %p691_p3 }
  0x13   :  { %699 = shalt.err (!%p696_p5)
}
  0x14   :  { %s700_s0 = scalar_lea.vmem %s21_s26, 6144  ;;  %p705_p7 = scmp.lt.s32.totalorder %s21_s26, %s21_s26 }
  0x15   :  { %p701_p6 = scmp.ne.s32.totalorder %s21_s26, %s700_s0  ;;  %p706_p8 = scmp.lt.s32.totalorder %s700_s0, %s700_s0 }
  0x17   :  { %p707_p9 = por %p706_p8, %p705_p7 }
  0x19   :  { %p708_p10 = pnand %p707_p9, %p701_p6 }
  0x1b   :  { %711 = shalt.err (!%p708_p10)
}
  0x1c   :  { %s950_s8 = smov 384   ;;  %s951_s9 = smov 24  }
  0x1d   :  { %26 = dma.hbm_to_vmem [thread:$0]  %s1177_s2, 6144, %s21_s26, [#allocation7], %s950_s8, %s950_s8, %s951_s9  }
  0x1e   :  { %928 = dma.done.wait [#allocation7], 6144  }
  0x1f   :  { %929 = vsyncadd [#allocation7], 4294961152  ;;  %vm32_vm0 = vcmask 261120   ;;  %v952_v0 = vmov 0.0   ;;  %s34_s12 = sld [smem:[#allocation5]]  ;;  %s953_s13 = smov [#allocation2]  }
  0x20   :  { %33 = vst.msk [vmem:[#allocation2 + $0x8] sm:$0xff] %vm32_vm0, %v952_v0  ;;  %s44_s14 = sshll.u32 %s953_s13, 4  ;;  %s1020_s15 = sld [smem:[#allocation5 + $0x1]]  ;;  %s1018_s14 = int_to_ptr.vmem [resolvable:$true] %s44_s14 }
  0x21   :  { %s954_s16 = smov [#allocation2 + $0x1]   ;;  %s1022_s18 = sld [smem:[#allocation5 + $0x2]] }
  0x22   :  { %s60_s17 = sshll.u32 %s954_s16, 4  ;;  %s955_s2 = smov [#allocation2 + $0x2]   ;;  %s1024_s17 = int_to_ptr.vmem [resolvable:$true] %s60_s17 }
  0x23   :  { %s76_s19 = sshll.u32 %s955_s2, 4  ;;  %s1026_s20 = sld [smem:[#allocation5 + $0x3]]  ;;  %s1028_s19 = int_to_ptr.vmem [resolvable:$true] %s76_s19 }
  0x24   :  { %s956_s22 = smov [#allocation2 + $0x3]   ;;  %s1039_s5 = scalar_lea.hbm %s1176_s1, 896 }
  0x25   :  { %s530_s21 = sshll.u32 %s34_s12, 4  ;;  %s1030_s23 = sshll.u32 %s956_s22, 4  ;;  %s93_s23 = int_to_ptr.vmem [resolvable:$true] %s1030_s23 }
  0x26   :  { %s36_s26 = scalar_lea.hbm %s1176_s1, %s530_s21  ;;  %s532_s27 = sshll.u32 %s1020_s15, 4 }
  0x27   :  { %s712_s28 = scalar_lea.hbm %s36_s26, 16  ;;  %p715_p12 = scmp.lt.u32.totalorder %s36_s26, %s1176_s1 }
  0x28   :  { %p713_p11 = scmp.ne.s32.totalorder %s36_s26, %s712_s28  ;;  %p716_p13 = scmp.lt.u32.totalorder %s1039_s5, %s712_s28 }
  0x29   :  { %p718_p1 = scmp.lt.u32.totalorder %s712_s28, %s36_s26 }
  0x2a   :  { %p717_p0 = por %p716_p13, %p715_p12 }
  0x2c   :  { %p719_p2 = por %p718_p1, %p717_p0 }
  0x2e   :  { %p720_p3 = pnand %p719_p2, %p713_p11 }
  0x30   :  { %723 = shalt.err (!%p720_p3)  }
  0x31   :  { %s724_s0 = scalar_lea.vmem %s1018_s14, 16  ;;  %s1048_s8 = scalar_lea.vmem %s1018_s14, 256 }
  0x32   :  { %p725_p4 = scmp.ne.s32.totalorder %s1018_s14, %s724_s0  ;;  %p729_p5 = scmp.lt.s32.totalorder %s1018_s14, %s1018_s14 }
  0x33   :  { %p730_p6 = scmp.lt.s32.totalorder %s1048_s8, %s724_s0 }
  0x35   :  { %p731_p7 = por %p730_p6, %p729_p5 }
  0x37   :  { %p732_p8 = pnand %p731_p7, %p725_p4 }
  0x39   :  { %735 = shalt.err (!%p732_p8)  }
  0x3a   :  { %47 = dma.hbm_to_vmem [thread:$0]  %s36_s26, 16, %s1018_s14, [#allocation3] }
  0x3b   :  { %s50_s11 = scalar_lea.hbm %s1176_s1, %s532_s27  ;;  %s534_s12 = sshll.u32 %s1022_s18, 4 }
  0x3c   :  { %s736_s13 = scalar_lea.hbm %s50_s11, 16  ;;  %p739_p10 = scmp.lt.u32.totalorder %s50_s11, %s1176_s1 }
  0x3d   :  { %p737_p9 = scmp.ne.s32.totalorder %s50_s11, %s736_s13  ;;  %p740_p11 = scmp.lt.u32.totalorder %s1039_s5, %s736_s13 }
  0x3e   :  { %p742_p13 = scmp.lt.u32.totalorder %s736_s13, %s50_s11 }
  0x3f   :  { %p741_p12 = por %p740_p11, %p739_p10 }
  0x41   :  { %p743_p0 = por %p742_p13, %p741_p12 }
  0x43   :  { %p744_p1 = pnand %p743_p0, %p737_p9 }
  0x45   :  { %747 = shalt.err (!%p744_p1)  }
  0x46   :  { %s748_s2 = scalar_lea.vmem %s1024_s17, 16  ;;  %p753_p3 = scmp.lt.s32.totalorder %s1024_s17, %s1018_s14 }
  0x47   :  { %p749_p2 = scmp.ne.s32.totalorder %s1024_s17, %s748_s2  ;;  %p754_p4 = scmp.lt.s32.totalorder %s1048_s8, %s748_s2 }
  0x49   :  { %p755_p5 = por %p754_p4, %p753_p3 }
  0x4b   :  { %p756_p6 = pnand %p755_p5, %p749_p2 }
  0x4d   :  { %759 = shalt.err (!%p756_p6)  }
  0x4e   :  { %63 = dma.hbm_to_vmem [thread:$0]  %s50_s11, 16, %s1024_s17, [#allocation3 + $0x1] }
  0x4f   :  { %s66_s22 = scalar_lea.hbm %s1176_s1, %s534_s12  ;;  %s536_s24 = sshll.u32 %s1026_s20, 4 }
  0x50   :  { %s760_s25 = scalar_lea.hbm %s66_s22, 16  ;;  %p763_p8 = scmp.lt.u32.totalorder %s66_s22, %s1176_s1 }
  0x51   :  { %p761_p7 = scmp.ne.s32.totalorder %s66_s22, %s760_s25  ;;  %p764_p9 = scmp.lt.u32.totalorder %s1039_s5, %s760_s25 }
  0x52   :  { %p766_p11 = scmp.lt.u32.totalorder %s760_s25, %s66_s22 }
  0x53   :  { %p765_p10 = por %p764_p9, %p763_p8 }
  0x55   :  { %p767_p12 = por %p766_p11, %p765_p10 }
  0x57   :  { %p768_p13 = pnand %p767_p12, %p761_p7 }
  0x59   :  { %771 = shalt.err (!%p768_p13)  }
  0x5a   :  { %s772_s17 = scalar_lea.vmem %s1028_s19, 16  ;;  %p777_p1 = scmp.lt.s32.totalorder %s1028_s19, %s1018_s14 }
  0x5b   :  { %p773_p0 = scmp.ne.s32.totalorder %s1028_s19, %s772_s17  ;;  %p778_p2 = scmp.lt.s32.totalorder %s1048_s8, %s772_s17 }
  0x5d   :  { %p779_p3 = por %p778_p2, %p777_p1 }
  0x5f   :  { %p780_p4 = pnand %p779_p3, %p773_p0 }
  0x61   :  { %783 = shalt.err (!%p780_p4)  }
  0x62   :  { %79 = dma.hbm_to_vmem [thread:$0]  %s66_s22, 16, %s1028_s19, [#allocation3 + $0x2] }
  0x63   :  { %s82_s29 = scalar_lea.hbm %s1176_s1, %s536_s24 }
  0x64   :  { %s784_s30 = scalar_lea.hbm %s82_s29, 16  ;;  %p787_p6 = scmp.lt.u32.totalorder %s82_s29, %s1176_s1 }
  0x65   :  { %p785_p5 = scmp.ne.s32.totalorder %s82_s29, %s784_s30  ;;  %p788_p7 = scmp.lt.u32.totalorder %s1039_s5, %s784_s30 }
  0x66   :  { %p790_p9 = scmp.lt.u32.totalorder %s784_s30, %s82_s29 }
  0x67   :  { %p789_p8 = por %p788_p7, %p787_p6 }
  0x69   :  { %p791_p10 = por %p790_p9, %p789_p8 }
  0x6b   :  { %p792_p11 = pnand %p791_p10, %p785_p5 }
  0x6d   :  { %795 = shalt.err (!%p792_p11)  }
  0x6e   :  { %s796_s0 = scalar_lea.vmem %s93_s23, 16  ;;  %p801_p13 = scmp.lt.s32.totalorder %s93_s23, %s1018_s14 }
  0x6f   :  { %p797_p12 = scmp.ne.s32.totalorder %s93_s23, %s796_s0  ;;  %p802_p0 = scmp.lt.s32.totalorder %s1048_s8, %s796_s0 }
  0x71   :  { %p803_p1 = por %p802_p0, %p801_p13 }
  0x73   :  { %p804_p2 = pnand %p803_p1, %p797_p12 }
  0x75   :  { %807 = shalt.err (!%p804_p2)  }
  0x76   :  { %95 = dma.hbm_to_vmem [thread:$0]  %s82_s29, 16, %s93_s23, [#allocation3 + $0x3] }
  0x77   :  { %s537_s19 = sld [smem:[#allocation5 + $0x4]]  ;;  %s957_s9 = smov [#allocation2 + $0x4]  }
  0x78   :  { %s108_s10 = sshll.u32 %s957_s9, 4  ;;  %s1092_s11 = sld [smem:[#allocation5 + $0x5]]  ;;  %s109_s10 = int_to_ptr.vmem [resolvable:$true] %s108_s10 }
  0x79   :  { %s958_s12 = smov [#allocation2 + $0x5]   ;;  %s1094_s15 = sld [smem:[#allocation5 + $0x6]] }
  0x7a   :  { %s124_s13 = sshll.u32 %s958_s12, 4  ;;  %s959_s16 = smov [#allocation2 + $0x6]   ;;  %s1096_s13 = int_to_ptr.vmem [resolvable:$true] %s124_s13 }
  0x7b   :  { %s140_s2 = sshll.u32 %s959_s16, 4  ;;  %s1098_s18 = sld [smem:[#allocation5 + $0x7]]  ;;  %s1100_s2 = int_to_ptr.vmem [resolvable:$true] %s140_s2 }
  0x7d   :  { %s538_s21 = sshll.u32 %s537_s19, 4 }
  0x7e   :  { %s98_s24 = scalar_lea.hbm %s1176_s1, %s538_s21  ;;  %s540_s25 = sshll.u32 %s1092_s11, 4 }
  0x7f   :  { %s808_s26 = scalar_lea.hbm %s98_s24, 16  ;;  %p811_p4 = scmp.lt.u32.totalorder %s98_s24, %s1176_s1 }
  0x80   :  { %p809_p3 = scmp.ne.s32.totalorder %s98_s24, %s808_s26  ;;  %p812_p5 = scmp.lt.u32.totalorder %s1039_s5, %s808_s26 }
  0x81   :  { %p814_p7 = scmp.lt.u32.totalorder %s808_s26, %s98_s24 }
  0x82   :  { %p813_p6 = por %p812_p5, %p811_p4 }
  0x84   :  { %p815_p8 = por %p814_p7, %p813_p6 }
  0x86   :  { %p816_p9 = pnand %p815_p8, %p809_p3 }
  0x88   :  { %819 = shalt.err (!%p816_p9)  }
  0x89   :  { %s820_s20 = scalar_lea.vmem %s109_s10, 16  ;;  %p825_p11 = scmp.lt.s32.totalorder %s109_s10, %s1018_s14 }
  0x8a   :  { %p821_p10 = scmp.ne.s32.totalorder %s109_s10, %s820_s20  ;;  %p826_p12 = scmp.lt.s32.totalorder %s1048_s8, %s820_s20 }
  0x8c   :  { %p827_p13 = por %p826_p12, %p825_p11 }
  0x8e   :  { %p828_p0 = pnand %p827_p13, %p821_p10 }
  0x90   :  { %831 = shalt.err (!%p828_p0)  }
  0x91   :  { %111 = dma.hbm_to_vmem [thread:$0]  %s98_s24, 16, %s109_s10, [#allocation3 + $0x4] }
  0x92   :  { %s114_s30 = scalar_lea.hbm %s1176_s1, %s540_s25  ;;  %s542_s6 = sshll.u32 %s1094_s15, 4 }
  0x93   :  { %s832_s7 = scalar_lea.hbm %s114_s30, 16  ;;  %p835_p2 = scmp.lt.u32.totalorder %s114_s30, %s1176_s1 }
  0x94   :  { %p833_p1 = scmp.ne.s32.totalorder %s114_s30, %s832_s7  ;;  %p836_p3 = scmp.lt.u32.totalorder %s1039_s5, %s832_s7 }
  0x95   :  { %p838_p5 = scmp.lt.u32.totalorder %s832_s7, %s114_s30 }
  0x96   :  { %p837_p4 = por %p836_p3, %p835_p2 }
  0x98   :  { %p839_p6 = por %p838_p5, %p837_p4 }
  0x9a   :  { %p840_p7 = pnand %p839_p6, %p833_p1 }
  0x9c   :  { %843 = shalt.err (!%p840_p7)  }
  0x9d   :  { %s844_s9 = scalar_lea.vmem %s1096_s13, 16  ;;  %p849_p9 = scmp.lt.s32.totalorder %s1096_s13, %s1018_s14 }
  0x9e   :  { %p845_p8 = scmp.ne.s32.totalorder %s1096_s13, %s844_s9  ;;  %p850_p10 = scmp.lt.s32.totalorder %s1048_s8, %s844_s9 }
  0xa0   :  { %p851_p11 = por %p850_p10, %p849_p9 }
  0xa2   :  { %p852_p12 = pnand %p851_p11, %p845_p8 }
  0xa4   :  { %855 = shalt.err (!%p852_p12)  }
  0xa5   :  { %127 = dma.hbm_to_vmem [thread:$0]  %s114_s30, 16, %s1096_s13, [#allocation3 + $0x5] }
  0xa6   :  { %s130_s12 = scalar_lea.hbm %s1176_s1, %s542_s6  ;;  %s544_s15 = sshll.u32 %s1098_s18, 4 }
  0xa7   :  { %s856_s16 = scalar_lea.hbm %s130_s12, 16  ;;  %p859_p0 = scmp.lt.u32.totalorder %s130_s12, %s1176_s1 }
  0xa8   :  { %p857_p13 = scmp.ne.s32.totalorder %s130_s12, %s856_s16  ;;  %p860_p1 = scmp.lt.u32.totalorder %s1039_s5, %s856_s16 }
  0xa9   :  { %p862_p3 = scmp.lt.u32.totalorder %s856_s16, %s130_s12 }
  0xaa   :  { %p861_p2 = por %p860_p1, %p859_p0 }
  0xac   :  { %p863_p4 = por %p862_p3, %p861_p2 }
  0xae   :  { %p864_p5 = pnand %p863_p4, %p857_p13 }
  0xb0   :  { %867 = shalt.err (!%p864_p5)  }
  0xb1   :  { %s868_s13 = scalar_lea.vmem %s1100_s2, 16  ;;  %p873_p7 = scmp.lt.s32.totalorder %s1100_s2, %s1018_s14 }
  0xb2   :  { %p869_p6 = scmp.ne.s32.totalorder %s1100_s2, %s868_s13  ;;  %p874_p8 = scmp.lt.s32.totalorder %s1048_s8, %s868_s13 }
  0xb4   :  { %p875_p9 = por %p874_p8, %p873_p7 }
  0xb6   :  { %p876_p10 = pnand %p875_p9, %p869_p6 }
  0xb8   :  { %879 = shalt.err (!%p876_p10)  }
  0xb9   :  { %143 = dma.hbm_to_vmem [thread:$0]  %s130_s12, 16, %s1100_s2, [#allocation3 + $0x6] }
  0xba   :  { %s146_s24 = scalar_lea.hbm %s1176_s1, %s544_s15  ;;  %s960_s25 = smov [#allocation2 + $0x7]  }
  0xbb   :  { %s156_s26 = sshll.u32 %s960_s25, 4  ;;  %s880_s27 = scalar_lea.hbm %s146_s24, 16  ;;  %s157_s26 = int_to_ptr.vmem [resolvable:$true] %s156_s26 }
  0xbc   :  { %p881_p11 = scmp.ne.s32.totalorder %s146_s24, %s880_s27  ;;  %p883_p12 = scmp.lt.u32.totalorder %s146_s24, %s1176_s1 }
  0xbd   :  { %p884_p13 = scmp.lt.u32.totalorder %s1039_s5, %s880_s27  ;;  %p886_p1 = scmp.lt.u32.totalorder %s880_s27, %s146_s24 }
  0xbf   :  { %p885_p0 = por %p884_p13, %p883_p12 }
  0xc1   :  { %p887_p2 = por %p886_p1, %p885_p0 }
  0xc3   :  { %p888_p3 = pnand %p887_p2, %p881_p11 }
  0xc5   :  { %891 = shalt.err (!%p888_p3)  }
  0xc6   :  { %s892_s2 = scalar_lea.vmem %s157_s26, 16  ;;  %p897_p5 = scmp.lt.s32.totalorder %s157_s26, %s1018_s14 }
  0xc7   :  { %p893_p4 = scmp.ne.s32.totalorder %s157_s26, %s892_s2  ;;  %p898_p6 = scmp.lt.s32.totalorder %s1048_s8, %s892_s2 }
  0xc9   :  { %p899_p7 = por %p898_p6, %p897_p5 }
  0xcb   :  { %p900_p8 = pnand %p899_p7, %p893_p4 }
  0xcd   :  { %903 = shalt.err (!%p900_p8)  }
  0xce   :  { %159 = dma.hbm_to_vmem [thread:$0]  %s146_s24, 16, %s157_s26, [#allocation3 + $0x7] }
  0xcf   :  { %930 = dma.done.wait [#allocation3], 16 }
  0xd0   :  { %931 = vsyncadd [#allocation3], 4294967280 }
  0xd1   :  { %932 = dma.done.wait [#allocation3 + $0x1], 16 }
  0xd2   :  { %933 = vsyncadd [#allocation3 + $0x1], 4294967280 }
  0xd3   :  { %934 = dma.done.wait [#allocation3 + $0x2], 16 }
  0xd4   :  { %935 = vsyncadd [#allocation3 + $0x2], 4294967280 }
  0xd5   :  { %936 = dma.done.wait [#allocation3 + $0x3], 16 }
  0xd6   :  { %937 = vsyncadd [#allocation3 + $0x3], 4294967280 }
  0xd7   :  { %938 = dma.done.wait [#allocation3 + $0x4], 16 }
  0xd8   :  { %939 = vsyncadd [#allocation3 + $0x4], 4294967280 }
  0xd9   :  { %940 = dma.done.wait [#allocation3 + $0x5], 16 }
  0xda   :  { %941 = vsyncadd [#allocation3 + $0x5], 4294967280 }
  0xdb   :  { %942 = dma.done.wait [#allocation3 + $0x6], 16 }
  0xdc   :  { %943 = vsyncadd [#allocation3 + $0x6], 4294967280 }
  0xdd   :  { %944 = dma.done.wait [#allocation3 + $0x7], 16 }
  0xde   :  { %945 = vsyncadd [#allocation3 + $0x7], 4294967280  ;;  %327 = vmatprep.mubr.f32.mxu0 %v952_v0  ;;  %v961_v1 = vmov 0.0|0.0   ;;  %vm962_vm1 = vmmov 0   ;;  %v178_v2 = vld [vmem:[#allocation2 + $0x1] sm:$0xff]  ;;  %s963_s1 = smov 32  }
  0xdf   :  { %637 = vmatprep.subr.bf16.mxu1 %v961_v1  ;;  %602 = vmatprep.mubr.msk.f32.mxu1 %vm962_vm1, %v952_v0  ;;  %v179_v3 = vld [vmem:[#allocation2 + $0x2] sm:$0xff]  ;;  %s964_s14 = smov 96   ;;  %v199_v5 = vld [vmem:[#allocation6 + $0x8] sm:$0xff]  ;;  %v202_v6 = vld [vmem:[#allocation6 + $0x20] sm:$0xff]  ;;  %s965_s5 = smov 64   ;;  %vm194_vm2 = vcmask 523264  }
  0xe0   :  { %v180_v4 = vld [vmem:[#allocation2 + $0x3] sm:$0xff]  ;;  %182 = vrot.lane.b32.xlu0 %v178_v2, %s963_s1  ;;  %v198_v7 = vld [vmem:[#allocation6] sm:$0xff]  ;;  %v605_v8 = vpack.c.bf16 %v202_v6, %v199_v5  ;;  %v203_v11 = vld [vmem:[#allocation6 + $0x28] sm:$0xff]  ;;  %vm196_vm3 = vcmask 785408   ;;  %vm439_vm7 = vcmask 1040384   ;;  %vm441_vm8 = vcmask 1041408  }
  0xe1   :  { %190 = vrot.lane.b32.xlu1 %v180_v4, %s964_s14  ;;  %v201_v9 = vld [vmem:[#allocation6 + $0x18] sm:$0xff]  ;;  %v200_v10 = vld [vmem:[#allocation6 + $0x10] sm:$0xff]  ;;  %v207_v18 = vld [vmem:[#allocation6 + $0x48] sm:$0xff] }
  0xe2   :  { %v607_v12 = vpack.c.bf16 %v201_v9, %v198_v7  ;;  %v638_v13 = vpack.c.bf16 %v203_v11, %v200_v10  ;;  %v205_v14 = vld [vmem:[#allocation6 + $0x38] sm:$0xff]  ;;  %v208_v15 = vld [vmem:[#allocation6 + $0x50] sm:$0xff]  ;;  %606 = vmatprep.subr.bf16.mxu0 %v605_v8  ;;  %v206_v19 = vld [vmem:[#allocation6 + $0x40] sm:$0xff] }
  0xe3   :  { %v204_v16 = vld [vmem:[#allocation6 + $0x30] sm:$0xff]  ;;  %v609_v17 = vpack.c.bf16 %v208_v15, %v205_v14  ;;  %v209_v20 = vld [vmem:[#allocation6 + $0x58] sm:$0xff]  ;;  %v211_v22 = vld [vmem:[#allocation6 + $0x68] sm:$0xff] }
  0xe4   :  { %186 = vrot.lane.b32.xlu0 %v179_v3, %s965_s5  ;;  %608 = vmatpush1.bf16.msra.mxu0 %v607_v12  ;;  %v611_v21 = vpack.c.bf16 %v207_v18, %v204_v16  ;;  %v214_v23 = vld [vmem:[#allocation6 + $0x80] sm:$0xff]  ;;  %v641_v24 = vpack.c.bf16 %v209_v20, %v206_v19  ;;  %v213_v27 = vld [vmem:[#allocation6 + $0x78] sm:$0xff]  ;;  %v212_v28 = vld [vmem:[#allocation6 + $0x70] sm:$0xff] }
  0xe5   :  { %639 = vmatpush3.bf16.msra.mxu1 %v638_v13  ;;  %610 = vmatprep.subr.bf16.mxu0 %v609_v17  ;;  %v613_v25 = vpack.c.bf16 %v214_v23, %v211_v22  ;;  %v210_v26 = vld [vmem:[#allocation6 + $0x60] sm:$0xff]  ;;  %v215_v29 = vld [vmem:[#allocation6 + $0x88] sm:$0xff]  ;;  %v217_v30 = vld [vmem:[#allocation6 + $0x98] sm:$0xff] }
  0xe6   :  { %640 = vmatprep.subr.bf16.mxu1 %v961_v1  ;;  %v220_v31 = vld [vmem:[#allocation6 + $0xb0] sm:$0xff]  ;;  %v615_v32 = vpack.c.bf16 %v213_v27, %v210_v26  ;;  %v644_v33 = vpack.c.bf16 %v215_v29, %v212_v28  ;;  %v219_v36 = vld [vmem:[#allocation6 + $0xa8] sm:$0xff]  ;;  %v218_v37 = vld [vmem:[#allocation6 + $0xa0] sm:$0xff] }
  0xe7   :  { %v617_v34 = vpack.c.bf16 %v220_v31, %v217_v30  ;;  %v216_v35 = vld [vmem:[#allocation6 + $0x90] sm:$0xff]  ;;  %v221_v38 = vld [vmem:[#allocation6 + $0xb8] sm:$0xff]  ;;  %v223_v39 = vld [vmem:[#allocation6 + $0xc8] sm:$0xff] }
  0xe8   :  { %612 = vmatpush1.bf16.msra.mxu0 %v611_v21  ;;  %v226_v40 = vld [vmem:[#allocation6 + $0xe0] sm:$0xff]  ;;  %v619_v41 = vpack.c.bf16 %v219_v36, %v216_v35  ;;  %v647_v42 = vpack.c.bf16 %v221_v38, %v218_v37  ;;  %v225_v45 = vld [vmem:[#allocation6 + $0xd8] sm:$0xff]  ;;  %v224_v46 = vld [vmem:[#allocation6 + $0xd0] sm:$0xff]  ;;  %v248_v21 = vlaneseq }
  0xe9   :  { %642 = vmatpush3.bf16.msra.mxu1 %v641_v24  ;;  %614 = vmatprep.subr.bf16.mxu0 %v613_v25  ;;  %v621_v43 = vpack.c.bf16 %v226_v40, %v223_v39  ;;  %v222_v44 = vld [vmem:[#allocation6 + $0xc0] sm:$0xff]  ;;  %v227_v47 = vld [vmem:[#allocation6 + $0xe8] sm:$0xff]  ;;  %v229_v48 = vld [vmem:[#allocation6 + $0xf8] sm:$0xff] }
  0xea   :  { %643 = vmatprep.subr.bf16.mxu1 %v961_v1  ;;  %v232_v49 = vld [vmem:[#allocation6 + $0x110] sm:$0xff]  ;;  %v623_v50 = vpack.c.bf16 %v225_v45, %v222_v44  ;;  %v650_v51 = vpack.c.bf16 %v227_v47, %v224_v46  ;;  %v231_v54 = vld [vmem:[#allocation6 + $0x108] sm:$0xff]  ;;  %v230_v55 = vld [vmem:[#allocation6 + $0x100] sm:$0xff]  ;;  %v249_v22 = vshrl.u32 %v248_v21, 7 }
  0xeb   :  { %v625_v52 = vpack.c.bf16 %v232_v49, %v229_v48  ;;  %v228_v53 = vld [vmem:[#allocation6 + $0xf0] sm:$0xff]  ;;  %v233_v56 = vld [vmem:[#allocation6 + $0x118] sm:$0xff]  ;;  %v235_v57 = vld [vmem:[#allocation6 + $0x128] sm:$0xff] }
  0xec   :  { %616 = vmatpush1.bf16.msra.mxu0 %v615_v32  ;;  %v238_v58 = vld [vmem:[#allocation6 + $0x140] sm:$0xff]  ;;  %v627_v59 = vpack.c.bf16 %v231_v54, %v228_v53  ;;  %v653_v60 = vpack.c.bf16 %v233_v56, %v230_v55  ;;  %v237_v63 = vld [vmem:[#allocation6 + $0x138] sm:$0xff]  ;;  %v236_v0 = vld [vmem:[#allocation6 + $0x130] sm:$0xff]  ;;  %v250_v23 = vsub.s32 0, %v249_v22  ;;  %v258_v24 = vsub.s32 2, %v249_v22 }
  0xed   :  { %645 = vmatpush3.bf16.msra.mxu1 %v644_v33  ;;  %618 = vmatprep.subr.bf16.mxu0 %v617_v34  ;;  %v629_v61 = vpack.c.bf16 %v238_v58, %v235_v57  ;;  %v234_v62 = vld [vmem:[#allocation6 + $0x120] sm:$0xff]  ;;  %v239_v2 = vld [vmem:[#allocation6 + $0x148] sm:$0xff]  ;;  %v241_v3 = vld [vmem:[#allocation6 + $0x158] sm:$0xff]  ;;  %v254_v25 = vsub.s32 1, %v249_v22  ;;  %vm409_vm4 = vcmp.lt.s32.totalorder %v249_v22, 7  ;;  %vm429_vm5 = vcmp.lt.s32.totalorder %v249_v22, 5 }
  0xee   :  { %646 = vmatprep.subr.bf16.mxu1 %v961_v1  ;;  %v244_v4 = vld [vmem:[#allocation6 + $0x170] sm:$0xff]  ;;  %v631_v5 = vpack.c.bf16 %v237_v63, %v234_v62  ;;  %v656_v6 = vpack.c.bf16 %v239_v2, %v236_v0  ;;  %v243_v9 = vld [vmem:[#allocation6 + $0x168] sm:$0xff]  ;;  %v242_v10 = vld [vmem:[#allocation6 + $0x160] sm:$0xff]  ;;  %vm419_vm6 = vcmp.lt.s32.totalorder %v249_v22, 6 }
  0xef   :  { %v633_v7 = vpack.c.bf16 %v244_v4, %v241_v3  ;;  %v240_v8 = vld [vmem:[#allocation6 + $0x150] sm:$0xff]  ;;  %v245_v11 = vld [vmem:[#allocation6 + $0x178] sm:$0xff] }
  0xf0   :  { %620 = vmatpush1.bf16.msra.mxu0 %v619_v41  ;;  %v635_v12 = vpack.c.bf16 %v243_v9, %v240_v8  ;;  %v659_v13 = vpack.c.bf16 %v245_v11, %v242_v10  ;;  %v177_v15 = vld [vmem:[#allocation2] sm:$0xff] }
  0xf1   :  { %648 = vmatpush3.bf16.msra.mxu1 %v647_v42  ;;  %622 = vmatprep.subr.bf16.mxu0 %v621_v43 }
  0xf2   :  { %649 = vmatprep.subr.bf16.mxu1 %v961_v1 }
  0xf4   :  { %624 = vmatpush1.bf16.msra.mxu0 %v623_v50 }
  0xf5   :  { %651 = vmatpush3.bf16.msra.mxu1 %v650_v51  ;;  %626 = vmatprep.subr.bf16.mxu0 %v625_v52 }
  0xf6   :  { %652 = vmatprep.subr.bf16.mxu1 %v961_v1 }
  0xf8   :  { %628 = vmatpush1.bf16.msra.mxu0 %v627_v59 }
  0xf9   :  { %654 = vmatpush3.bf16.msra.mxu1 %v653_v60  ;;  %630 = vmatprep.subr.bf16.mxu0 %v629_v61 }
  0xfa   :  { %655 = vmatprep.subr.bf16.mxu1 %v961_v1 }
  0xfc   :  { %632 = vmatpush1.bf16.msra.mxu0 %v631_v5 }
  0xfd   :  { %657 = vmatpush3.bf16.msra.mxu1 %v656_v6  ;;  %634 = vmatprep.subr.bf16.mxu0 %v633_v7 }
  0xfe   :  { %658 = vmatprep.subr.bf16.mxu1 %v961_v1  ;;  %v246_v1 = vld [vmem:[%s1178_s3] sm:$0x7]  ;;  %s966_s3 = smov [#allocation9]  }
  0xff   :  { %v251_v26 = vrot.slane %v246_v1, %v250_v23  ;;  %v259_v27 = vrot.slane %v246_v1, %v258_v24  ;;  %v255_v28 = vrot.slane %v246_v1, %v254_v25  ;;  %s450_s29 = sshll.u32 %s966_s3, 4  ;;  %s451_s29 = int_to_ptr.vmem [resolvable:$true] %s450_s29 }
 0x100   :  { %636 = vmatpush1.bf16.msra.mxu0 %v635_v12  ;;  %s904_s30 = scalar_lea.vmem %s451_s29, 64  ;;  %p909_p10 = scmp.lt.s32.totalorder %s451_s29, %s451_s29 }
 0x101   :  { %660 = vmatpush3.bf16.msra.mxu1 %v659_v13  ;;  %p905_p9 = scmp.ne.s32.totalorder %s451_s29, %s904_s30  ;;  %p910_p11 = scmp.lt.s32.totalorder %s904_s30, %s904_s30 }
 0x103   :  { %p911_p12 = por %p910_p11, %p909_p10 }
 0x105   :  { %p912_p13 = pnand %p911_p12, %p905_p9 }
 0x152   :  { %v183_v14 = vpop.permute.xlu0 %182 }
 0x153   :  { %v191_v16 = vpop.permute.xlu1 %190  ;;  %v193_v17 = vsel %vm32_vm0, %v177_v15, %v183_v14 }
 0x156   :  { %v187_v18 = vpop.permute.xlu0 %186 }
 0x157   :  { %v195_v19 = vsel %vm194_vm2, %v193_v17, %v187_v18 }
 0x158   :  { %v197_v20 = vsel %vm196_vm3, %v195_v19, %v191_v16 }
 0x159   :  { %328 = vmatmul.mubr.f32.vlgmr.msra.gmra.mrb[0].mxu0 %v197_v20  ;;  %603 = vmatmul.mubr.f32.vlgmr.msra.gmra.mrb[0].mxu1 %v197_v20 }
 0x22c   :  { %v329_v29 = vpop.f32.mrb[0].mxu0  ;;  %v400_v30 = vpop.f32.mrb[0].mxu1 }
 0x22d   :  { %v330_v31 = vadd.f32 %v329_v29, %v251_v26  ;;  %v401_v32 = vadd.f32 %v400_v30, %v259_v27  ;;  %v331_v33 = vpop.f32.mrb[1].mxu0  ;;  %v604_v34 = vpop.f32.mrb[1].mxu1 }
 0x22e   :  { %v332_v35 = vadd.f32 %v331_v33, %v255_v28 }
 0x22f   :  { %v404_v36 = vmax.f32 %v330_v31, 0.0  ;;  %v406_v37 = vmax.f32 %v401_v32, 0.0 }
 0x230   :  { %v405_v38 = vmax.f32 %v332_v35, 0.0 }
 0x231   :  { %v412_v39 = vsel %vm409_vm4, %v404_v36, 0.0  ;;  %v432_v40 = vsel %vm429_vm5, %v406_v37, 0.0 }
 0x232   :  { %v413_v41 = vrot.slane %v412_v39, 4  ;;  %v433_v42 = vrot.slane %v432_v40, 4  ;;  %v422_v43 = vsel %vm419_vm6, %v405_v38, 0.0 }
 0x233   :  { %v423_v44 = vrot.slane %v422_v43, 4 }
 0x234   :  { %v414_v45 = vmax.f32 %v412_v39, %v413_v41  ;;  %v434_v46 = vmax.f32 %v432_v40, %v433_v42 }
 0x235   :  { %v424_v47 = vmax.f32 %v422_v43, %v423_v44 }
 0x236   :  { %v415_v48 = vrot.slane %v414_v45, 2  ;;  %v435_v49 = vrot.slane %v434_v46, 2 }
 0x237   :  { %v425_v50 = vrot.slane %v424_v47, 2 }
 0x238   :  { %v416_v51 = vmax.f32 %v414_v45, %v415_v48  ;;  %v436_v52 = vmax.f32 %v434_v46, %v435_v49 }
 0x239   :  { %v426_v53 = vmax.f32 %v424_v47, %v425_v50 }
 0x23a   :  { %v417_v54 = vrot.slane %v416_v51, 1  ;;  %v437_v55 = vrot.slane %v436_v52, 1 }
 0x23b   :  { %v427_v56 = vrot.slane %v426_v53, 1 }
 0x23c   :  { %v418_v57 = vmax.f32 %v416_v51, %v417_v54  ;;  %v438_v59 = vmax.f32 %v436_v52, %v437_v55 }
 0x23d   :  { %v428_v58 = vmax.f32 %v426_v53, %v427_v56 }
 0x23f   :  { %v440_v60 = vsel %vm439_vm7, %v418_v57, %v428_v58 }
 0x240   :  { %v442_v61 = vsel %vm441_vm8, %v440_v60, %v438_v59 }
 0x241   :  { %443 = vst [vmem:[#allocation9] sm:$0x7] %v442_v61 }
 0x242   :  { %915 = shalt.err (!%p912_p13)
}
 0x243   :  { %s916_s0 = scalar_lea.hbm %s1179_s4, 64 }
 0x244   :  { %p917_p0 = scmp.ne.s32.totalorder %s1179_s4, %s916_s0  ;;  %p920_p1 = scmp.lt.u32.totalorder %s916_s0, %s1179_s4 }
 0x246   :  { %p922_p2 = pnand %p920_p1, %p917_p0 }
 0x248   :  { %925 = shalt.err (!%p922_p2)
}
 0x249   :  { %453 = dma.vmem_to_hbm [thread:$0]  %s451_s29, 64, %s1179_s4, [#allocation8]  }
 0x24a   :  { %946 = dma.done.wait [#allocation8], 64  }
 0x24b   :  { %947 = vsyncadd [#allocation8], 4294967232 }
 0x24c   :  { %457 = vsyncpa [#allocation7], 1 }
 0x24d   :  { %458 = vsyncpa [#allocation8], 1 }
 0x24e   :  { %459 = vsyncmov [#allocation3] }
 0x251   :  { %s460_s16 = vpop.sfrf %459 }
 0x252   :  { %p545_p3 = scmp.ne.s32.totalorder %s460_s16, 0 }
 0x254   :  { %464 = shalt.err (%p545_p3)  }
 0x255   :  { %466 = vsyncmov [#allocation3 + $0x1] }
 0x258   :  { %s467_s21 = vpop.sfrf %466 }
 0x259   :  { %p546_p4 = scmp.ne.s32.totalorder %s467_s21, 0 }
 0x25b   :  { %471 = shalt.err (%p546_p4)  }
 0x25c   :  { %473 = vsyncmov [#allocation3 + $0x2] }
 0x25f   :  { %s474_s23 = vpop.sfrf %473 }
 0x260   :  { %p547_p5 = scmp.ne.s32.totalorder %s474_s23, 0 }
 0x262   :  { %478 = shalt.err (%p547_p5)  }
 0x263   :  { %480 = vsyncmov [#allocation3 + $0x3] }
 0x266   :  { %s481_s13 = vpop.sfrf %480 }
 0x267   :  { %p548_p6 = scmp.ne.s32.totalorder %s481_s13, 0 }
 0x269   :  { %485 = shalt.err (%p548_p6)  }
 0x26a   :  { %487 = vsyncmov [#allocation3 + $0x4] }
 0x26d   :  { %s488_s4 = vpop.sfrf %487 }
 0x26e   :  { %p549_p7 = scmp.ne.s32.totalorder %s488_s4, 0 }
 0x270   :  { %492 = shalt.err (%p549_p7)  }
 0x271   :  { %494 = vsyncmov [#allocation3 + $0x5] }
 0x274   :  { %s495_s18 = vpop.sfrf %494 }
 0x275   :  { %p550_p8 = scmp.ne.s32.totalorder %s495_s18, 0 }
 0x277   :  { %499 = shalt.err (%p550_p8)  }
 0x278   :  { %501 = vsyncmov [#allocation3 + $0x6] }
 0x27b   :  { %s502_s22 = vpop.sfrf %501 }
 0x27c   :  { %p551_p9 = scmp.ne.s32.totalorder %s502_s22, 0 }
 0x27e   :  { %506 = shalt.err (%p551_p9)  }
 0x27f   :  { %508 = vsyncmov [#allocation3 + $0x7] }
 0x282   :  { %s509_s24 = vpop.sfrf %508 }
 0x283   :  { %p552_p10 = scmp.ne.s32.totalorder %s509_s24, 0 }
 0x285   :  { %513 = shalt.err (%p552_p10)  }

</bundles_post_ra>
